<compile_context>
chip_gen: v7x
topology: tpu7x:2x2x1
jax: 0.10.0
libtpu: 0.0.40
codegen_flags: <defaults>
</compile_context>

<pallas_src>
import jax
import jax.numpy as jnp
from jax.experimental import pallas as pl
from jax.experimental.pallas import tpu as pltpu


def _round_up(x, m):
    return ((x + m - 1) // m) * m


def _outconv_kernel(x_ref, w_ref, b_ref, o_ref):
    # x_ref: (Nb, Cin, ts)   tile of voxels, channel-major
    # w_ref: (Cout, Cin)     full weight (VMEM-resident across the grid)
    # b_ref: (Cout, 1)       bias (broadcast over the spatial tile)
    # o_ref: (Nb, Cout, ts)  lane-dense output tile
    w = w_ref[...]
    b = b_ref[...]
    nb = x_ref.shape[0]
    for i in range(nb):  # Nb is a small static int -> cheap unroll
        acc = jnp.dot(w, x_ref[i], preferred_element_type=jnp.float32)
        o_ref[i] = (acc + b).astype(o_ref.dtype)


def outconv_forward(x_ncdhw, weight, bias, *, tile_s=16384, max_nb=8):
    """1x1x1 Conv3d forward in native NCDHW layout.

    x_ncdhw: (N, Cin, D, H, W) float32
    weight : (Cout, Cin, 1, 1, 1) float32  (PyTorch Conv3d layout)
    bias   : (Cout,) float32
    returns: (N, Cout, D, H, W) float32
    """
    N, Cin, D, H, W = x_ncdhw.shape
    Cout = weight.shape[0]
    S = D * H * W

    # Free (contiguous) reshapes; no transposes, no padding copies.
    x3 = x_ncdhw.reshape(N, Cin, S)
    w2d = weight.reshape(Cout, Cin)
    b2d = bias.reshape(Cout, 1)

    tile_s = _round_up(tile_s, 128)
    if S > tile_s:
        # Large volumes: big lane-dense spatial tiles, one sample per step.
        ts = tile_s
        nb = 1
    else:
        # Tiny volumes: cover all of S (rounded up to a 128 lane multiple so
        # stores stay unmasked) and batch several samples per grid step to
        # amortize the fixed per-step overhead.
        ts = _round_up(S, 128)
        nb = max(1, min(N, max_nb, tile_s // ts))

    grid = (pl.cdiv(N, nb), pl.cdiv(S, ts))

    cost = pl.CostEstimate(
        flops=2 * N * Cout * Cin * S,
        transcendentals=0,
        bytes_accessed=4 * (N * Cin * S + N * Cout * S + Cout * Cin + Cout),
    )

    out3 = pl.pallas_call(
        _outconv_kernel,
        out_shape=jax.ShapeDtypeStruct((N, Cout, S), x_ncdhw.dtype),
        grid=grid,
        in_specs=[
            pl.BlockSpec((nb, Cin, ts), lambda n, s: (n, 0, s)),
            pl.BlockSpec((Cout, Cin), lambda n, s: (0, 0)),
            pl.BlockSpec((Cout, 1), lambda n, s: (0, 0)),
        ],
        out_specs=pl.BlockSpec((nb, Cout, ts), lambda n, s: (n, 0, s)),
        compiler_params=pltpu.CompilerParams(
            dimension_semantics=("parallel", "parallel"),
            vmem_limit_bytes=40 << 20,
        ),
        cost_estimate=cost,
    )(x3, w2d, b2d)

    return out3.reshape(N, Cout, D, H, W)


def init_outconv_params(key, in_channels, out_channels):
    # PyTorch Conv3d default init: U(-1/sqrt(fan_in), 1/sqrt(fan_in)),
    # fan_in = Cin * 1 * 1 * 1.
    kw, kb = jax.random.split(key)
    bound = 1.0 / jnp.sqrt(jnp.float32(in_channels))
    weight = jax.random.uniform(
        kw, (out_channels, in_channels, 1, 1, 1), jnp.float32, -bound, bound
    )
    bias = jax.random.uniform(kb, (out_channels,), jnp.float32, -bound, bound)
    return weight, bias


def _reference(x, weight, bias):
    Cout = weight.shape[0]
    Cin = weight.shape[1]
    return jnp.einsum("ncdhw,oc->nodhw", x, weight.reshape(Cout, Cin)) + bias[
        None, :, None, None, None
    ]


if __name__ == "__main__":
    key = jax.random.PRNGKey(0)
    k_x1, k_x2, k_p = jax.random.split(key, 3)

    # OutConv(64, 4) as in UNet(1, 4).
    Cin, Cout = 64, 4
    weight, bias = init_outconv_params(k_p, Cin, Cout)

    # --- Test 1: tiny-S regime (exercises the Nb-batched, S-rounded path). ---
    N, D, H, W = 2, 4, 8, 8  # S = 256
    x_small = jax.random.normal(k_x1, (N, Cin, D, H, W), jnp.float32)
    y_small = outconv_forward(x_small, weight, bias)
    jax.block_until_ready(y_small)
    ref_small = _reference(x_small, weight, bias)
    assert y_small.shape == (N, Cout, D, H, W)
    assert jnp.allclose(y_small, ref_small, atol=1e-4, rtol=1e-4)

    # --- Test 2: large-S regime (exercises spatial tiling + partial block). ---
    N2, D2, H2, W2 = 1, 8, 48, 48  # S = 18432 > 16384 -> 2 spatial tiles
    x_big = jax.random.normal(k_x2, (N2, Cin, D2, H2, W2), jnp.float32)
    y_big = outconv_forward(x_big, weight, bias)
    jax.block_until_ready(y_big)
    ref_big = _reference(x_big, weight, bias)
    assert y_big.shape == (N2, Cout, D2, H2, W2)
    assert jnp.allclose(y_big, ref_big, atol=1e-4, rtol=1e-4)

    print("KERNEL_OK")
</pallas_src>

<mosaic_0001>
module attributes {stable_mosaic.version = 11 : i64} {
  func.func @_outconv_kernel(%arg0: i32, %arg1: i32, %arg2: memref<2x64x256xf32, #tpu.memory_space<vmem>>, %arg3: memref<4x64xf32, #tpu.memory_space<vmem>>, %arg4: memref<4x1xf32, #tpu.memory_space<vmem>>, %arg5: memref<2x4x256xf32, #tpu.memory_space<vmem>>) attributes {dimension_semantics = [#tpu.dimension_semantics<parallel>, #tpu.dimension_semantics<parallel>], iteration_bounds = array<i64: 1, 1>, scalar_prefetch = 0 : i64, scratch_operands = 0 : i64, tpu.core_type = #tpu.core_type<tc>, window_params = [{transform_indices = @transform_0, window_bounds = array<i64: 2, 64, 256>}, {pipeline_mode = #tpu.pipeline_mode<synchronous>, transform_indices = @transform_1, window_bounds = array<i64: 4, 64>}, {pipeline_mode = #tpu.pipeline_mode<synchronous>, transform_indices = @transform_2, window_bounds = array<i64: 4, 1>}, {transform_indices = @transform_3, window_bounds = array<i64: 2, 4, 256>}]} {
    %c0 = arith.constant 0 : index
    %c0_0 = arith.constant 0 : index
    %0 = vector.load %arg3[%c0, %c0_0] : memref<4x64xf32, #tpu.memory_space<vmem>>, vector<4x64xf32>
    %c0_1 = arith.constant 0 : index
    %c0_2 = arith.constant 0 : index
    %1 = vector.load %arg4[%c0_1, %c0_2] : memref<4x1xf32, #tpu.memory_space<vmem>>, vector<4x1xf32>
    %c0_3 = arith.constant 0 : index
    %c0_4 = arith.constant 0 : index
    %c0_5 = arith.constant 0 : index
    %2 = vector.load %arg2[%c0_3, %c0_4, %c0_5] : memref<2x64x256xf32, #tpu.memory_space<vmem>>, vector<1x64x256xf32>
    %3 = vector.shape_cast %2 : vector<1x64x256xf32> to vector<64x256xf32>
    %cst = arith.constant dense<0.000000e+00> : vector<4x256xf32>
    %4 = tpu.matmul %0, %3, %cst {dimension_numbers = #tpu.dot_dimension_numbers<[1], [0], [0], [1], [0, 0, 1, 1], [], []>} : vector<4x64xf32>, vector<64x256xf32>, vector<4x256xf32> -> vector<4x256xf32>
    %5 = vector.broadcast %1 : vector<4x1xf32> to vector<4x256xf32>
    %6 = arith.addf %4, %5 : vector<4x256xf32>
    %c0_6 = arith.constant 0 : index
    %c0_7 = arith.constant 0 : index
    %c0_8 = arith.constant 0 : index
    %7 = vector.load %arg5[%c0_6, %c0_7, %c0_8] : memref<2x4x256xf32, #tpu.memory_space<vmem>>, vector<1x4x256xf32>
    %8 = vector.shape_cast %7 : vector<1x4x256xf32> to vector<4x256xf32>
    %9 = vector.shape_cast %6 : vector<4x256xf32> to vector<1x4x256xf32>
    tpu.vector_store %arg5[%c0_6, %c0_7, %c0_8], %9 {strides = array<i32>} : memref<2x4x256xf32, #tpu.memory_space<vmem>>, vector<1x4x256xf32>,
    %c1 = arith.constant 1 : index
    %c0_9 = arith.constant 0 : index
    %c0_10 = arith.constant 0 : index
    %10 = vector.load %arg2[%c1, %c0_9, %c0_10] : memref<2x64x256xf32, #tpu.memory_space<vmem>>, vector<1x64x256xf32>
    %11 = vector.shape_cast %10 : vector<1x64x256xf32> to vector<64x256xf32>
    %cst_11 = arith.constant dense<0.000000e+00> : vector<4x256xf32>
    %12 = tpu.matmul %0, %11, %cst_11 {dimension_numbers = #tpu.dot_dimension_numbers<[1], [0], [0], [1], [0, 0, 1, 1], [], []>} : vector<4x64xf32>, vector<64x256xf32>, vector<4x256xf32> -> vector<4x256xf32>
    %13 = vector.broadcast %1 : vector<4x1xf32> to vector<4x256xf32>
    %14 = arith.addf %12, %13 : vector<4x256xf32>
    %c1_12 = arith.constant 1 : index
    %c0_13 = arith.constant 0 : index
    %c0_14 = arith.constant 0 : index
    %15 = vector.load %arg5[%c1_12, %c0_13, %c0_14] : memref<2x4x256xf32, #tpu.memory_space<vmem>>, vector<1x4x256xf32>
    %16 = vector.shape_cast %15 : vector<1x4x256xf32> to vector<4x256xf32>
    %17 = vector.shape_cast %14 : vector<4x256xf32> to vector<1x4x256xf32>
    tpu.vector_store %arg5[%c1_12, %c0_13, %c0_14], %17 {strides = array<i32>} : memref<2x4x256xf32, #tpu.memory_space<vmem>>, vector<1x4x256xf32>,
    return
  }
  func.func @transform_0(%arg0: i32, %arg1: i32) -> (i32, i32, i32) {
    %c0_i32 = arith.constant 0 : i32
    %c0_i32_0 = arith.constant 0 : i32
    return %arg0, %c0_i32, %arg1 : i32, i32, i32
  }
  func.func @transform_1(%arg0: i32, %arg1: i32) -> (i32, i32) {
    %c0_i32 = arith.constant 0 : i32
    %c0_i32_0 = arith.constant 0 : i32
    %c0_i32_1 = arith.constant 0 : i32
    return %c0_i32, %c0_i32_0 : i32, i32
  }
  func.func @transform_2(%arg0: i32, %arg1: i32) -> (i32, i32) {
    %c0_i32 = arith.constant 0 : i32
    %c0_i32_0 = arith.constant 0 : i32
    %c0_i32_1 = arith.constant 0 : i32
    return %c0_i32, %c0_i32_0 : i32, i32
  }
  func.func @transform_3(%arg0: i32, %arg1: i32) -> (i32, i32, i32) {
    %c0_i32 = arith.constant 0 : i32
    %c0_i32_0 = arith.constant 0 : i32
    return %arg0, %c0_i32, %arg1 : i32, i32, i32
  }
}

</mosaic_0001>

<bundles_post_ra>
// kernel: tpu_custom_call.1
= control target key start
LH: loop header
LB: loop body
LE: loop exit
PB: predicated region body
PF: predicated region fallthrough
CT: control target
= control target key end

     0   :  { %8 = vsyncpa [#allocation3], 0  ;;  %s392_s0 = inlined_call_operand.hbm [shape: f32[2,64,256], index: 0, kind: input, shape index: {}]   ;;  %s393_s1 = inlined_call_operand.vmem [shape: f32[4,64], index: 1, kind: input, shape index: {}]   ;;  %s394_s2 = inlined_call_operand.vmem [shape: f32[4,1], index: 2, kind: input, shape index: {}]   ;;  %s395_s3 = inlined_call_operand.hbm [shape: f32[2,4,256], index: 3, kind: output, shape index: {}]  }
   0x1   :  { %9 = vsyncpa [#allocation4], 0  ;;  %s334_s12 = smov [#allocation2]   ;;  %s286_s16 = scalar_lea.hbm %s392_s0, 4096 }
   0x2   :  { %s15_s13 = sshll.u32 %s334_s12, 4  ;;  %p287_p0 = scmp.ne.s32.totalorder %s392_s0, %s286_s16  ;;  %s16_s13 = int_to_ptr.vmem [resolvable:$true] %s15_s13 }
   0x3   :  { %p290_p1 = scmp.lt.u32.totalorder %s286_s16, %s392_s0 }
   0x5   :  { %p292_p2 = pnand %p290_p1, %p287_p0 }
   0x7   :  { %295 = shalt.err (!%p292_p2)
}
   0x8   :  { %s296_s21 = scalar_lea.vmem %s16_s13, 4096  ;;  %p301_p4 = scmp.lt.s32.totalorder %s16_s13, %s16_s13 }
   0x9   :  { %p297_p3 = scmp.ne.s32.totalorder %s16_s13, %s296_s21  ;;  %p302_p5 = scmp.lt.s32.totalorder %s296_s21, %s296_s21 }
   0xb   :  { %p303_p6 = por %p302_p5, %p301_p4 }
   0xd   :  { %p304_p7 = pnand %p303_p6, %p297_p3 }
   0xf   :  { %307 = shalt.err (!%p304_p7)
}
  0x10   :  { %s335_s22 = smov 256   ;;  %s336_s23 = smov 16  }
  0x11   :  { %21 = dma.hbm_to_vmem [thread:$0]  %s392_s0, 4096, %s16_s13, [#allocation3], %s335_s22, %s335_s22, %s336_s23  }
  0x12   :  { %330 = dma.done.wait [#allocation3], 4096  }
  0x13   :  { %331 = vsyncadd [#allocation3], 4294963200  ;;  %v337_v0 = vmov 0.0   ;;  %v338_v1 = vmov 0   ;;  %v32_v2 = vld [vmem:[#allocation2 + $0x8] sm:$0xff]  ;;  %v34_v3 = vld [vmem:[#allocation2 + $0x18] sm:$0xff] }
  0x14   :  { %120 = vmatprep.mubr.f32.mxu0 %v337_v0  ;;  %213 = vmatprep.mubr.f32.mxu1 %v337_v0  ;;  %v134_v4 = vld [vmem:[#allocation2 + $0x88] sm:$0xff]  ;;  %v245_v5 = vpack.c.bf16 %v34_v3, %v32_v2  ;;  %v136_v6 = vld [vmem:[#allocation2 + $0x98] sm:$0xff]  ;;  %v31_v7 = vld [vmem:[#allocation2] sm:$0xff]  ;;  %vm52_vm0 = vcmask 523264  }
  0x15   :  { %285 = vset.pattern.permute.xlu0 %v338_v1  ;;  %v33_v8 = vld [vmem:[#allocation2 + $0x10] sm:$0xff]  ;;  %v261_v9 = vpack.c.bf16 %v136_v6, %v134_v4  ;;  %v133_v11 = vld [vmem:[#allocation2 + $0x80] sm:$0xff]  ;;  %v36_v13 = vld [vmem:[#allocation2 + $0x28] sm:$0xff] }
  0x16   :  { %v247_v10 = vpack.c.bf16 %v33_v8, %v31_v7  ;;  %v135_v12 = vld [vmem:[#allocation2 + $0x90] sm:$0xff]  ;;  %246 = vmatprep.subr.bf16.mxu0 %v245_v5  ;;  %v38_v15 = vld [vmem:[#allocation2 + $0x38] sm:$0xff]  ;;  %v138_v16 = vld [vmem:[#allocation2 + $0xa8] sm:$0xff] }
  0x17   :  { %v263_v14 = vpack.c.bf16 %v135_v12, %v133_v11  ;;  %v140_v17 = vld [vmem:[#allocation2 + $0xb8] sm:$0xff]  ;;  %262 = vmatprep.subr.bf16.mxu1 %v261_v9  ;;  %v249_v18 = vpack.c.bf16 %v38_v15, %v36_v13  ;;  %v35_v20 = vld [vmem:[#allocation2 + $0x20] sm:$0xff]  ;;  %v37_v21 = vld [vmem:[#allocation2 + $0x30] sm:$0xff] }
  0x18   :  { %248 = vmatpush1.bf16.msra.mxu0 %v247_v10  ;;  %v265_v19 = vpack.c.bf16 %v140_v17, %v138_v16  ;;  %v137_v22 = vld [vmem:[#allocation2 + $0xa0] sm:$0xff]  ;;  %v251_v23 = vpack.c.bf16 %v37_v21, %v35_v20  ;;  %v139_v24 = vld [vmem:[#allocation2 + $0xb0] sm:$0xff]  ;;  %v40_v25 = vld [vmem:[#allocation2 + $0x48] sm:$0xff] }
  0x19   :  { %264 = vmatpush1.bf16.msra.mxu1 %v263_v14  ;;  %v42_v26 = vld [vmem:[#allocation2 + $0x58] sm:$0xff]  ;;  %250 = vmatprep.subr.bf16.mxu0 %v249_v18  ;;  %v267_v27 = vpack.c.bf16 %v139_v24, %v137_v22  ;;  %v142_v29 = vld [vmem:[#allocation2 + $0xc8] sm:$0xff]  ;;  %v39_v31 = vld [vmem:[#allocation2 + $0x40] sm:$0xff] }
  0x1a   :  { %266 = vmatprep.subr.bf16.mxu1 %v265_v19  ;;  %v253_v28 = vpack.c.bf16 %v42_v26, %v40_v25  ;;  %v144_v30 = vld [vmem:[#allocation2 + $0xd8] sm:$0xff]  ;;  %v41_v33 = vld [vmem:[#allocation2 + $0x50] sm:$0xff]  ;;  %v141_v34 = vld [vmem:[#allocation2 + $0xc0] sm:$0xff] }
  0x1b   :  { %v269_v32 = vpack.c.bf16 %v144_v30, %v142_v29  ;;  %v143_v35 = vld [vmem:[#allocation2 + $0xd0] sm:$0xff]  ;;  %v255_v36 = vpack.c.bf16 %v41_v33, %v39_v31  ;;  %v44_v37 = vld [vmem:[#allocation2 + $0x68] sm:$0xff]  ;;  %v46_v38 = vld [vmem:[#allocation2 + $0x78] sm:$0xff] }
  0x1c   :  { %252 = vmatpush1.bf16.msra.mxu0 %v251_v23  ;;  %v146_v39 = vld [vmem:[#allocation2 + $0xe8] sm:$0xff]  ;;  %v271_v40 = vpack.c.bf16 %v143_v35, %v141_v34  ;;  %v257_v41 = vpack.c.bf16 %v46_v38, %v44_v37  ;;  %v148_v42 = vld [vmem:[#allocation2 + $0xf8] sm:$0xff]  ;;  %v43_v43 = vld [vmem:[#allocation2 + $0x60] sm:$0xff] }
  0x1d   :  { %268 = vmatpush1.bf16.msra.mxu1 %v267_v27  ;;  %254 = vmatprep.subr.bf16.mxu0 %v253_v28  ;;  %v45_v44 = vld [vmem:[#allocation2 + $0x70] sm:$0xff]  ;;  %v273_v45 = vpack.c.bf16 %v148_v42, %v146_v39  ;;  %v145_v46 = vld [vmem:[#allocation2 + $0xe0] sm:$0xff] }
  0x1e   :  { %270 = vmatprep.subr.bf16.mxu1 %v269_v32  ;;  %v147_v47 = vld [vmem:[#allocation2 + $0xf0] sm:$0xff]  ;;  %v30_v48 = vld [vmem:[%s394_s2] sm:$0xf]  ;;  %v259_v49 = vpack.c.bf16 %v45_v44, %v43_v43  ;;  %s339_s2 = smov [#allocation5]  }
  0x1f   :  { %49 = vperm.xlu0 %285, %v30_v48   ;;  %v275_v50 = vpack.c.bf16 %v147_v47, %v145_v46  ;;  %v29_v51 = vld [vmem:[%s393_s1] sm:$0xf]  ;;  %s231_s29 = sshll.u32 %s339_s2, 4  ;;  %s232_s29 = int_to_ptr.vmem [resolvable:$true] %s231_s29 }
  0x20   :  { %256 = vmatpush1.bf16.msra.mxu0 %v255_v36  ;;  %s308_s1 = scalar_lea.vmem %s232_s29, 256  ;;  %p313_p9 = scmp.lt.s32.totalorder %s232_s29, %s232_s29 }
  0x21   :  { %272 = vmatpush1.bf16.msra.mxu1 %v271_v40  ;;  %258 = vmatprep.subr.bf16.mxu0 %v257_v41  ;;  %p309_p8 = scmp.ne.s32.totalorder %s232_s29, %s308_s1  ;;  %p314_p10 = scmp.lt.s32.totalorder %s308_s1, %s308_s1 }
  0x22   :  { %274 = vmatprep.subr.bf16.mxu1 %v273_v45 }
  0x23   :  { %p315_p11 = por %p314_p10, %p313_p9 }
  0x24   :  { %260 = vmatpush1.bf16.msra.mxu0 %v259_v49 }
  0x25   :  { %276 = vmatpush1.bf16.msra.mxu1 %v275_v50  ;;  %p316_p12 = pnand %p315_p11, %p309_p8 }
  0x27   :  { %243 = vmatmul.mubr.msk.f32.vlgmr.msra.gmra.mrb[0].mxu0 %vm52_vm0, %v29_v51 }
  0x28   :  { %244 = vmatmul.mubr.msk.f32.vlgmr.msra.gmra.mrb[0].mxu1 %vm52_vm0, %v29_v51 }
  0x9e   :  { %v50_v52 = vpop.permute.xlu0 %49 }
  0xfa   :  { %v122_v53 = vpop.f32.mrb[0].mxu0 }
  0xfb   :  { %v123_v54 = vadd.f32 %v122_v53, %v50_v52  ;;  %v215_v55 = vpop.f32.mrb[0].mxu1  ;;  %v124_v56 = vpop.f32.mrb[1].mxu0 }
  0xfc   :  { %v216_v57 = vadd.f32 %v215_v55, %v50_v52  ;;  %v125_v58 = vadd.f32 %v124_v56, %v50_v52  ;;  %v217_v59 = vpop.f32.mrb[1].mxu1 }
  0xfd   :  { %v218_v60 = vadd.f32 %v217_v59, %v50_v52 }
  0xfe   :  { %v129_v61 = vcombine.low %v123_v54, %v125_v58 }
  0xff   :  { %v222_v62 = vcombine.low %v216_v57, %v218_v60 }
 0x100   :  { %131 = vst [vmem:[#allocation5] sm:$0xff] %v129_v61 }
 0x101   :  { %225 = vst [vmem:[#allocation5 + $0x8] sm:$0xff] %v222_v62 }
 0x102   :  { %319 = shalt.err (!%p316_p12)
}
 0x103   :  { %s320_s5 = scalar_lea.hbm %s395_s3, 256 }
 0x104   :  { %p321_p13 = scmp.ne.s32.totalorder %s395_s3, %s320_s5  ;;  %p324_p0 = scmp.lt.u32.totalorder %s320_s5, %s395_s3 }
 0x106   :  { %p326_p1 = pnand %p324_p0, %p321_p13 }
 0x108   :  { %329 = shalt.err (!%p326_p1)
}
 0x109   :  { %s340_s10 = smov 128   ;;  %s341_s11 = smov 8  }
 0x10a   :  { %237 = dma.vmem_to_hbm [thread:$0]  %s232_s29, 256, %s395_s3, [#allocation4], %s340_s10, %s340_s10, %s341_s11  }
 0x10b   :  { %332 = dma.done.wait [#allocation4], 256  }
 0x10c   :  { %333 = vsyncadd [#allocation4], 4294967040 }
 0x10d   :  { %241 = vsyncpa [#allocation3], 1 }
 0x10e   :  { %242 = vsyncpa [#allocation4], 1 }

</bundles_post_ra>
